<compile_context>
chip_gen: v5e
topology: v5e:2x2
jax: 0.10.0
libtpu: 0.0.40
codegen_flags: <defaults>
</compile_context>

<pallas_src>
import jax
import jax.numpy as jnp
from jax.experimental import pallas as pl
from jax.experimental.pallas import tpu as pltpu


def _round_up(x, m):
    return ((x + m - 1) // m) * m


def _vmem_budget_bytes():
    """Generation-aware scoped-VMEM budget (bytes), with headroom."""
    cap = None
    try:
        cap = getattr(pltpu.get_tpu_info(), "vmem_capacity_bytes", None)
    except Exception:
        cap = None
    if not cap or cap <= 0:
        cap = 64 << 20            # conservative default (v7x-class: 64 MiB / TC)
    return int(cap * 3 // 4)      # ~48 MiB on v7x, ~96 MiB on v5e / v6e


def _choose_tm(M):
    """Row-tile size: full extent for small M, otherwise 256/512 with >=2 tiles."""
    if M <= 256:
        return M                  # single full-extent tile (always layout-legal)
    if M < 2 * 512:
        return 256                # >=2 tiles -> both TensorCores get work (v7x)
    return 512


# ----------------------------- kernels ---------------------------------------

def _patch_embed_kernel_single_k(patches_ref, w_ref, b_ref, out_ref):
    """grid = (M tiles,).  Whole weight VMEM-resident; no accumulator needed."""
    out_ref[...] = (
        jnp.dot(patches_ref[...], w_ref[...], preferred_element_type=jnp.float32)
        + b_ref[...]
    ).astype(out_ref.dtype)


def _patch_embed_kernel_multi_k(patches_ref, w_ref, b_ref, out_ref, acc_ref):
    """grid = (M tiles, K tiles); K innermost reduction with f32 accumulator."""
    k = pl.program_id(1)

    @pl.when(k == 0)
    def _init():
        # Bias folded into the accumulator init (saves a separate epilogue add).
        acc_ref[...] = jnp.broadcast_to(b_ref[...], acc_ref.shape)

    acc_ref[...] += jnp.dot(patches_ref[...], w_ref[...],
                            preferred_element_type=jnp.float32)

    @pl.when(k == pl.num_programs(1) - 1)
    def _finalize():
        out_ref[...] = acc_ref[...].astype(out_ref.dtype)


# ----------------------------- wrapper ----------------------------------------

def patch_embed_var_size(x, weight, bias, patch_size, compute_dtype=jnp.bfloat16):
    """x: (B, C, H, W) NCHW; weight: (D, C, p, p); bias: (D,) -> (B, N, D)."""
    B, C, H, W = x.shape
    D = weight.shape[0]
    p = patch_size
    gh, gw = H // p, W // p
    N = gh * gw
    K = C * p * p
    M = B * N
    out_dtype = x.dtype

    # ---- host-side layout glue (single bf16 transpose copy, no padding) -----
    # Cast to the compute dtype *before* the rearrangement so the copy moves
    # half the bytes.  Conv2d(kernel=stride=p, VALID) ignores remainder pixels.
    # TODO(synk): fuse this (B,C,gh,p,gw,p)->(M,K) extraction into the kernel's
    # input pipeline (in-kernel relayout from an NCHW BlockSpec) to remove the
    # remaining HBM round trip of the rearranged activation.
    xs = x[:, :, :gh * p, :gw * p].astype(compute_dtype)
    patches = xs.reshape(B, C, gh, p, gw, p)
    patches = patches.transpose(0, 2, 4, 1, 3, 5).reshape(M, K)

    # Weight / bias are tiny: pad only them to a lane-dense D.
    D_pad = _round_up(D, 128)
    w_mat = weight.reshape(D, K).T                                  # (K, D)
    w_mat = jnp.pad(w_mat, ((0, 0), (0, D_pad - D))).astype(compute_dtype)
    b_mat = jnp.pad(bias, (0, D_pad - D)).reshape(1, D_pad).astype(jnp.float32)

    in_b = jnp.dtype(compute_dtype).itemsize
    out_b = jnp.dtype(out_dtype).itemsize
    budget = _vmem_budget_bytes()

    tm = _choose_tm(M)

    def _fast_vmem(tm_):
        return (2 * tm_ * K * in_b          # double-buffered patch stream
                + 2 * K * D_pad * in_b      # resident weight (x2 conservatively)
                + 2 * tm_ * D_pad * out_b   # double-buffered output
                + 2 * D_pad * 4             # bias
                + (2 << 20))                # Mosaic internal scratch headroom

    while _fast_vmem(tm) > budget and tm > 256:
        tm = max(256, tm // 2)
    single_k = _fast_vmem(tm) <= budget

    cost = pl.CostEstimate(
        flops=2 * M * K * D_pad,
        transcendentals=0,
        bytes_accessed=(M * K * in_b + K * D_pad * in_b + M * D_pad * out_b),
    )

    if single_k:
        # ---- common case: whole weight resident, no reduction grid axis -----
        m_tiles = pl.cdiv(M, tm)
        est = _fast_vmem(tm)
        vmem_limit = int(min(budget, max(2 * est, 16 << 20)))
        out = pl.pallas_call(
            _patch_embed_kernel_single_k,
            out_shape=jax.ShapeDtypeStruct((M, D_pad), out_dtype),
            grid_spec=pltpu.PrefetchScalarGridSpec(
                num_scalar_prefetch=0,
                grid=(m_tiles,),
                in_specs=[
                    pl.BlockSpec((tm, K), lambda i: (i, 0)),       # patch rows
                    pl.BlockSpec((K, D_pad), lambda i: (0, 0)),    # weight (resident)
                    pl.BlockSpec((1, D_pad), lambda i: (0, 0)),    # bias
                ],
                out_specs=pl.BlockSpec((tm, D_pad), lambda i: (i, 0)),
            ),
            compiler_params=pltpu.CompilerParams(
                dimension_semantics=("parallel",),
                vmem_limit_bytes=vmem_limit,
            ),
            cost_estimate=cost,
        )(patches, w_mat, b_mat)
    else:
        # ---- rare fallback: K too large for a resident weight ---------------
        K_pad = _round_up(K, 128)
        tk = 128
        for cand in (2048, 1024, 512, 256, 128):
            if K_pad % cand == 0:
                tk = cand
                break

        def _acc_vmem(tm_, tk_):
            return (2 * tm_ * tk_ * in_b + 2 * tk_ * D_pad * in_b
                    + 2 * tm_ * D_pad * out_b + tm_ * D_pad * 4
                    + 2 * D_pad * 4 + (2 << 20))

        while _acc_vmem(tm, tk) > budget and tk > 128:
            tk //= 2                       # halving preserves divisibility of K_pad
        while _acc_vmem(tm, tk) > budget and tm > 256:
            tm = max(256, tm // 2)

        patches_p = jnp.pad(patches, ((0, 0), (0, K_pad - K)))
        w_p = jnp.pad(w_mat, ((0, K_pad - K), (0, 0)))

        m_tiles = pl.cdiv(M, tm)
        k_tiles = K_pad // tk
        est = _acc_vmem(tm, tk)
        vmem_limit = int(min(budget, max(2 * est, 16 << 20)))
        out = pl.pallas_call(
            _patch_embed_kernel_multi_k,
            out_shape=jax.ShapeDtypeStruct((M, D_pad), out_dtype),
            grid_spec=pltpu.PrefetchScalarGridSpec(
                num_scalar_prefetch=0,
                grid=(m_tiles, k_tiles),
                in_specs=[
                    pl.BlockSpec((tm, tk), lambda i, k: (i, k)),       # patches
                    pl.BlockSpec((tk, D_pad), lambda i, k: (k, 0)),    # weight
                    pl.BlockSpec((1, D_pad), lambda i, k: (0, 0)),     # bias
                ],
                out_specs=pl.BlockSpec((tm, D_pad), lambda i, k: (i, 0)),
                scratch_shapes=[pltpu.VMEM((tm, D_pad), jnp.float32)],
            ),
            compiler_params=pltpu.CompilerParams(
                dimension_semantics=("parallel", "arbitrary"),
                vmem_limit_bytes=vmem_limit,
            ),
            cost_estimate=cost,
        )(patches_p, w_p, b_mat)

    return out[:, :D].reshape(B, N, D)


if __name__ == "__main__":
    # Small shapes consistent with the module: B=2, C=4, H=W=16, patch=8,
    # embed_dim=32  ->  num_patches = (16//8)*(16//8) = 4.
    B, C, H, W = 2, 4, 16, 16
    patch = 8
    embed_dim = 32

    key = jax.random.PRNGKey(0)
    kx, kw, kb = jax.random.split(key, 3)
    x = jax.random.normal(kx, (B, C, H, W), dtype=jnp.float32)
    weight = jax.random.normal(kw, (embed_dim, C, patch, patch),
                               dtype=jnp.float32) * 0.02
    bias = jax.random.normal(kb, (embed_dim,), dtype=jnp.float32) * 0.02

    out = patch_embed_var_size(x, weight, bias, patch)
    out = jax.block_until_ready(out)

    # Reference: plain-JAX strided conv (exact PyTorch Conv2d semantics).
    ref = jax.lax.conv_general_dilated(
        x, weight, window_strides=(patch, patch), padding="VALID",
        dimension_numbers=("NCHW", "OIHW", "NCHW"))
    ref = ref + bias.reshape(1, embed_dim, 1, 1)
    ref = ref.reshape(B, embed_dim, -1).transpose(0, 2, 1)

    N = (H // patch) * (W // patch)
    assert out.shape == (B, N, embed_dim)
    # bf16 inputs with f32 accumulation -> loose tolerance vs pure-f32 conv.
    assert jnp.allclose(out, ref, atol=1e-2, rtol=1e-2)

    # f32 compute path must match the reference tightly.
    out_f32 = jax.block_until_ready(
        patch_embed_var_size(x, weight, bias, patch,
                             compute_dtype=jnp.float32))
    assert jnp.allclose(out_f32, ref, atol=1e-4, rtol=1e-4)

    print("KERNEL_OK")
</pallas_src>

<mosaic_0001>
module attributes {stable_mosaic.version = 11 : i64} {
  func.func @_patch_embed_kernel_single_k(%arg0: i32, %arg1: memref<8x256xbf16, #tpu.memory_space<vmem>>, %arg2: memref<256x128xbf16, #tpu.memory_space<vmem>>, %arg3: memref<1x128xf32, #tpu.memory_space<vmem>>, %arg4: memref<8x128xf32, #tpu.memory_space<vmem>>) attributes {dimension_semantics = [#tpu.dimension_semantics<parallel>], iteration_bounds = array<i64: 1>, scalar_prefetch = 0 : i64, scratch_operands = 0 : i64, tpu.core_type = #tpu.core_type<tc>, window_params = [{transform_indices = @transform_0, window_bounds = array<i64: 8, 256>}, {pipeline_mode = #tpu.pipeline_mode<synchronous>, transform_indices = @transform_1, window_bounds = array<i64: 256, 128>}, {pipeline_mode = #tpu.pipeline_mode<synchronous>, transform_indices = @transform_2, window_bounds = array<i64: 1, 128>}, {transform_indices = @transform_3, window_bounds = array<i64: 8, 128>}]} {
    %c0 = arith.constant 0 : index
    %c0_0 = arith.constant 0 : index
    %0 = vector.load %arg1[%c0, %c0_0] : memref<8x256xbf16, #tpu.memory_space<vmem>>, vector<8x256xbf16>
    %c0_1 = arith.constant 0 : index
    %c0_2 = arith.constant 0 : index
    %1 = vector.load %arg2[%c0_1, %c0_2] : memref<256x128xbf16, #tpu.memory_space<vmem>>, vector<256x128xbf16>
    %cst = arith.constant dense<0.000000e+00> : vector<8x128xf32>
    %2 = tpu.matmul %0, %1, %cst {dimension_numbers = #tpu.dot_dimension_numbers<[1], [0], [0], [1], [0, 0, 1, 1], [], []>} : vector<8x256xbf16>, vector<256x128xbf16>, vector<8x128xf32> -> vector<8x128xf32>
    %c0_3 = arith.constant 0 : index
    %c0_4 = arith.constant 0 : index
    %3 = vector.load %arg3[%c0_3, %c0_4] : memref<1x128xf32, #tpu.memory_space<vmem>>, vector<1x128xf32>
    %4 = vector.broadcast %3 : vector<1x128xf32> to vector<8x128xf32>
    %5 = arith.addf %2, %4 : vector<8x128xf32>
    %c0_5 = arith.constant 0 : index
    %c0_6 = arith.constant 0 : index
    %6 = vector.load %arg4[%c0_5, %c0_6] : memref<8x128xf32, #tpu.memory_space<vmem>>, vector<8x128xf32>
    tpu.vector_store %arg4[%c0_5, %c0_6], %5 {strides = array<i32>} : memref<8x128xf32, #tpu.memory_space<vmem>>, vector<8x128xf32>,
    return
  }
  func.func @transform_0(%arg0: i32) -> (i32, i32) {
    %c0_i32 = arith.constant 0 : i32
    %c0_i32_0 = arith.constant 0 : i32
    return %arg0, %c0_i32 : i32, i32
  }
  func.func @transform_1(%arg0: i32) -> (i32, i32) {
    %c0_i32 = arith.constant 0 : i32
    %c0_i32_0 = arith.constant 0 : i32
    %c0_i32_1 = arith.constant 0 : i32
    return %c0_i32, %c0_i32_0 : i32, i32
  }
  func.func @transform_2(%arg0: i32) -> (i32, i32) {
    %c0_i32 = arith.constant 0 : i32
    %c0_i32_0 = arith.constant 0 : i32
    %c0_i32_1 = arith.constant 0 : i32
    return %c0_i32, %c0_i32_0 : i32, i32
  }
  func.func @transform_3(%arg0: i32) -> (i32, i32) {
    %c0_i32 = arith.constant 0 : i32
    %c0_i32_0 = arith.constant 0 : i32
    return %arg0, %c0_i32 : i32, i32
  }
}

</mosaic_0001>

<bundles_post_ra>
// kernel: tpu_custom_call.1
= control target key start
LH: loop header
LB: loop body
LE: loop exit
PB: predicated region body
PF: predicated region fallthrough
CT: control target
= control target key end

     0   :  { %8 = vsyncpa [#allocation3], 0  ;;  %s431_s0 = inlined_call_operand.hbm [shape: bf16[8,256], index: 0, kind: input, shape index: {}]   ;;  %s432_s1 = inlined_call_operand.hbm [shape: bf16[256,128], index: 1, kind: input, shape index: {}]   ;;  %s433_s2 = inlined_call_operand.vmem [shape: f32[1,128], index: 2, kind: input, shape index: {}]   ;;  %s434_s3 = inlined_call_operand.hbm [shape: f32[8,128], index: 3, kind: output, shape index: {}]  }
   0x1   :  { %9 = vsyncpa [#allocation6], 0 }
   0x2   :  { %10 = vsyncpa [#allocation4], 0  ;;  %s16_s14 = sshll.u32 %s431_s0, 4  ;;  %s394_s15 = smov [#allocation2]   ;;  %s17_s14 = int_to_ptr.hbm [resolvable:$true] %s16_s14 }
   0x3   :  { %s18_s16 = sshll.u32 %s394_s15, 4  ;;  %s26_s19 = sshll.u32 %s432_s1, 4  ;;  %s19_s16 = int_to_ptr.vmem [resolvable:$true] %s18_s16  ;;  %s27_s19 = int_to_ptr.hbm [resolvable:$true] %s26_s19 }
   0x4   :  { %21 = dma.hbm_to_vmem [thread:$0]  %s17_s14, 128, %s19_s16, [#allocation3]  }
   0x5   :  { %s395_s20 = smov [#allocation5]   ;;  %s396_s22 = smov 64  }
   0x6   :  { %s28_s21 = sshll.u32 %s395_s20, 4  ;;  %s397_s23 = smov 4   ;;  %s29_s21 = int_to_ptr.vmem [resolvable:$true] %s28_s21 }
   0x7   :  { %34 = dma.hbm_to_vmem [thread:$0]  %s27_s19, 2048, %s29_s21, [#allocation6], %s396_s22, %s396_s22, %s397_s23  }
   0x8   :  { %388 = dma.done.wait [#allocation3], 128  }
   0x9   :  { %389 = vsyncadd [#allocation3], 4294967168 }
   0xa   :  { %390 = dma.done.wait [#allocation6], 2048  }
   0xb   :  { %391 = vsyncadd [#allocation6], 4294965248  ;;  %v301_v0 = vld [vmem:[#allocation5 + $0x38] sm:$0xff]  ;;  %v300_v2 = vld [vmem:[#allocation5 + $0x30] sm:$0xff]  ;;  %s398_s24 = smov [#allocation7]   ;;  %s219_s28 = sshll.u32 %s434_s3, 4  ;;  %s220_s28 = int_to_ptr.hbm [resolvable:$true] %s219_s28 }
   0xc   :  { %v309_v1 = vld [vmem:[#allocation5 + $0x78] sm:$0xff]  ;;  %185 = vmatpush.bf16.msra.mxu0 %v301_v0  ;;  %v308_v3 = vld [vmem:[#allocation5 + $0x70] sm:$0xff]  ;;  %v299_v4 = vld [vmem:[#allocation5 + $0x28] sm:$0xff]  ;;  %s217_s25 = sshll.u32 %s398_s24, 4  ;;  %s218_s25 = int_to_ptr.vmem [resolvable:$true] %s217_s25 }
   0xd   :  { %198 = vmatpush.bf16.msra.mxu1 %v309_v1  ;;  %v307_v5 = vld [vmem:[#allocation5 + $0x68] sm:$0xff]  ;;  %v298_v6 = vld [vmem:[#allocation5 + $0x20] sm:$0xff]  ;;  %v297_v8 = vld [vmem:[#allocation5 + $0x18] sm:$0xff] }
   0xe   :  { %v306_v7 = vld [vmem:[#allocation5 + $0x60] sm:$0xff]  ;;  %v305_v9 = vld [vmem:[#allocation5 + $0x58] sm:$0xff]  ;;  %v296_v10 = vld [vmem:[#allocation5 + $0x10] sm:$0xff] }
   0xf   :  { %v304_v11 = vld [vmem:[#allocation5 + $0x50] sm:$0xff]  ;;  %v295_v12 = vld [vmem:[#allocation5 + $0x8] sm:$0xff]  ;;  %v45_v14 = vld [vmem:[#allocation2] sm:$0xff] }
  0x10   :  { %186 = vmatpush.bf16.msra.mxu0 %v300_v2  ;;  %v303_v13 = vld [vmem:[#allocation5 + $0x48] sm:$0xff]  ;;  %v83_v15 = vunpack.c.l.b16 %v45_v14  ;;  %v84_v16 = vunpack.c.h.b16 %v45_v14  ;;  %v294_v17 = vld [vmem:[#allocation5] sm:$0xff]  ;;  %v315_v21 = vld [vmem:[%s433_s2] ss:$0 sm:$0xff] }
  0x11   :  { %199 = vmatpush.bf16.msra.mxu1 %v308_v3  ;;  %v302_v18 = vld [vmem:[#allocation5 + $0x40] sm:$0xff] }
  0x12   :  { %v85_v19 = vpack.c.b16 %v83_v15, %v83_v15  ;;  %v86_v20 = vpack.c.b16 %v84_v16, %v84_v16 }
  0x14   :  { %187 = vmatpush.bf16.msra.mxu0 %v299_v4 }
  0x15   :  { %200 = vmatpush.bf16.msra.mxu1 %v307_v5 }
  0x18   :  { %188 = vmatpush.bf16.msra.mxu0 %v298_v6 }
  0x19   :  { %201 = vmatpush.bf16.msra.mxu1 %v306_v7 }
  0x1c   :  { %189 = vmatpush.bf16.msra.mxu0 %v297_v8 }
  0x1d   :  { %202 = vmatpush.bf16.msra.mxu1 %v305_v9 }
  0x20   :  { %190 = vmatpush.bf16.msra.mxu0 %v296_v10 }
  0x21   :  { %203 = vmatpush.bf16.msra.mxu1 %v304_v11 }
  0x24   :  { %191 = vmatpush.bf16.msra.mxu0 %v295_v12 }
  0x25   :  { %204 = vmatpush.bf16.msra.mxu1 %v303_v13 }
  0x28   :  { %192 = vmatpush.bf16.msra.mxu0 %v294_v17 }
  0x29   :  { %205 = vmatpush.bf16.msra.mxu1 %v302_v18 }
  0x2b   :  { %193 = vmatmul.bf16.vlgmr.msra.gmra.mxu0 %v85_v19 }
  0x2c   :  { %206 = vmatmul.bf16.vlgmr.msra.gmra.mxu1 %v86_v20 }
  0xa8   :  { %v194_v22 = vpop.f32.mrf.mxu0 }
  0xa9   :  { %v207_v23 = vpop.f32.mrf.mxu1  ;;  %v195_v24 = vadd.f32 %v315_v21, %v194_v22 }
  0xab   :  { %v208_v25 = vadd.f32 %v207_v23, %v195_v24 }
  0xad   :  { %211 = vst [vmem:[#allocation7] sm:$0xff] %v208_v25 }
  0xae   :  { %222 = dma.vmem_to_hbm [thread:$0]  %s218_s25, 128, %s220_s28, [#allocation4]  }
  0xb0   :  { %v196_v26 = vpop.f32.mrf.mxu0 }
  0xb1   :  { %v209_v27 = vpop.f32.mrf.mxu1 }
  0xb2   :  { %392 = dma.done.wait [#allocation4], 128  }
  0xb3   :  { %393 = vsyncadd [#allocation4], 4294967168 }
  0xb4   :  { %227 = vsyncpa [#allocation3], 1 }
  0xb5   :  { %228 = vsyncpa [#allocation6], 1 }
  0xb6   :  { %229 = vsyncpa [#allocation4], 1 }

</bundles_post_ra>
